<compile_context>
chip_gen: v6e
topology: v6e:2x2x1
jax: 0.10.0
libtpu: 0.0.40
codegen_flags: <defaults>
</compile_context>

<pallas_src>
import functools

import jax
import jax.numpy as jnp
from jax.experimental import pallas as pl
from jax.experimental.pallas import tpu as pltpu

_EPS = 1e-6  # default eps of torch.nn.functional.pairwise_distance


def _contrastive_loss_kernel(x1_ref, x2_ref, label_ref, out_ref, *,
                             margin, n_rows, tile_n):
    # Upcast inside the kernel (free VPU work; HBM traffic stays at input dtype).
    x1 = x1_ref[...].astype(jnp.float32)                   # (tile_n, D)
    x2 = x2_ref[...].astype(jnp.float32)                   # (tile_n, D)

    diff = x1 - x2 + _EPS
    sq = jnp.sum(diff * diff, axis=-1, keepdims=True)      # (tile_n, 1) XLU reduce
    dist = jnp.sqrt(sq)                                     # EUP, hidden under DMA
    hinge = jnp.maximum(margin - dist, 0.0)

    # Mask rows past the true batch size. Must be a select (jnp.where), not a
    # multiply: padded VMEM rows may hold inf/NaN and NaN * 0 == NaN.
    row = (pl.program_id(0) * tile_n
           + jax.lax.broadcasted_iota(jnp.int32, (tile_n, 1), 0))
    valid = row < n_rows

    # loss_r = sq_r + label_r * (hinge_r^2 - sq_r)  (reuses sq for the neg. term).
    sq_v = jnp.where(valid, sq, 0.0)                        # (tile_n, 1)
    t_col = jnp.where(valid, hinge * hinge - sq, 0.0)       # (tile_n, 1)

    term1 = jnp.sum(sq_v)                                   # scalar

    # Lane-dense label row (1, tile_n): its per-row values live in lanes while
    # sq/hinge live in sublanes, so contract them on the MXU instead of paying an
    # XLU lane<->sublane relayout. Broadcasts keep the matmul a friendly
    # (8, K) @ (K, 128); every element of the result equals sum_r label_r * t_r.
    lab8 = jnp.broadcast_to(label_ref[...], (8, tile_n))    # sublane broadcast
    t128 = jnp.broadcast_to(t_col, (tile_n, 128))           # lane broadcast
    dot_res = jnp.dot(lab8, t128,
                      preferred_element_type=jnp.float32,
                      precision=jax.lax.Precision.HIGHEST)  # (8, 128)

    # Lane-dense (8,128) output block: tile partial sum in [0,0], zeros elsewhere.
    r = jax.lax.broadcasted_iota(jnp.int32, (8, 128), 0)
    c = jax.lax.broadcasted_iota(jnp.int32, (8, 128), 1)
    out_ref[...] = jnp.where((r == 0) & (c == 0), term1 + dot_res, 0.0)


def _round_up(x, m):
    return ((x + m - 1) // m) * m


def _vmem_limit_bytes():
    """Explicit scoped-VMEM limit: ~64 MiB on v5e/v6e (128 MiB phys), ~48 MiB on
    v7x (64 MiB phys per TensorCore); conservative fallback if the query fails."""
    cap = 64 * 1024 * 1024
    try:
        cap = int(pltpu.get_tpu_info().vmem_capacity_bytes)
    except Exception:
        pass
    limit = min((3 * cap) // 4, cap - (16 << 20), 64 << 20)
    return int(max(limit, 24 << 20))


def contrastive_loss(x1_embd, x2_embd, label, margin=1.0, tile_rows=None):
    """x1_embd, x2_embd: (N, D) f32/bf16; label: (N,) any numeric. Returns f32 scalar."""
    n, d = x1_embd.shape
    assert x2_embd.shape == (n, d)

    itemsize = jnp.dtype(x1_embd.dtype).itemsize
    d_pad = _round_up(d, 128)            # lane padding of the VMEM embedding tiles
    vmem_limit = _vmem_limit_bytes()

    # Per-row VMEM footprint (bytes), counting lane padding:
    #   * 2 embedding inputs x 2 pipeline buffers at input dtype (d padded to 128)
    #   * f32 in-kernel row tensors (upcasts / diff / diff^2) live around the reduce
    #   * (tile_n, 1)-style f32 columns are physically padded to 128 lanes (512 B/row)
    #   * lane-dense label block: 8-sublane-padded f32, double-buffered, + (8,T) bcast
    per_row = (4 * d_pad * itemsize) + (16 * d_pad) + (8 * 512) + 96
    usable = max(vmem_limit - (6 << 20), 4 << 20)   # headroom: out buffers, scratch
    max_rows = max(usable // per_row, 32)

    # Row alignment: 128-row tiles satisfy f32/bf16/int8 sublane packing; fallback
    # alignments per dtype keep small / user-specified tiles legal.
    align = 32 if itemsize == 1 else (16 if itemsize == 2 else 8)

    if tile_rows is not None:
        tile_n = min(_round_up(max(int(tile_rows), align), align), n)
    elif n <= 256:
        tile_n = n                                   # single exact tile (== full dim)
    elif max_rows >= n:
        # One tile would fit, but use >=2 so both v7x TensorCores stream work
        # (the grid axis is "parallel"); costs one extra ~0.35us step elsewhere.
        tile_n = _round_up(pl.cdiv(n, 2), 128)
    else:
        tile_n = (max_rows // 128) * 128
        if tile_n == 0:
            # Very large embedding dim: fall back to the minimum legal row tile.
            tile_n = max((max_rows // align) * align, align)
    num_tiles = int(pl.cdiv(n, tile_n))

    # Lane-dense label: one contiguous (tile_n,) f32 row per tile, zero-padded.
    total = num_tiles * tile_n
    lab = label.reshape(-1).astype(jnp.float32)
    lab = jnp.pad(lab, (0, total - n))
    label2d = lab.reshape(num_tiles, tile_n)

    kernel = functools.partial(
        _contrastive_loss_kernel,
        margin=float(margin), n_rows=n, tile_n=tile_n,
    )

    cost = pl.CostEstimate(
        flops=int(5 * n * d + 2 * 8 * 128 * total),
        transcendentals=int(n),
        bytes_accessed=int(2 * n * d * itemsize + total * 4
                           + num_tiles * 8 * 128 * 4),
    )

    partials = pl.pallas_call(
        kernel,
        out_shape=jax.ShapeDtypeStruct((num_tiles, 8, 128), jnp.float32),
        grid=(num_tiles,),
        in_specs=[
            pl.BlockSpec((tile_n, d), lambda i: (i, 0)),
            pl.BlockSpec((tile_n, d), lambda i: (i, 0)),
            pl.BlockSpec((1, tile_n), lambda i: (i, 0)),
        ],
        # Squeezed leading dim -> kernel sees an (8, 128) block per tile. Per-tile
        # partials (instead of a resident accumulator) keep the axis megacore-
        # shardable on v7x; writeback is num_tiles * 4 KiB, negligible.
        out_specs=pl.BlockSpec((None, 8, 128), lambda i: (i, 0, 0)),
        compiler_params=pltpu.CompilerParams(
            dimension_semantics=("parallel",),
            vmem_limit_bytes=int(vmem_limit),
        ),
        cost_estimate=cost,
    )(x1_embd, x2_embd, label2d)

    # All entries except the per-tile [0, 0] slots are zero.
    return jnp.sum(partials) * (1.0 / n)


def contrastive_loss_ref(x1_embd, x2_embd, label, margin=1.0):
    """Pure-JAX reference matching the PyTorch module semantics (f32 math)."""
    x1 = x1_embd.astype(jnp.float32)
    x2 = x2_embd.astype(jnp.float32)
    label = label.astype(jnp.float32)
    diff = x1 - x2 + _EPS
    dist = jnp.sqrt(jnp.sum(diff * diff, axis=-1))
    return jnp.mean(
        (1.0 - label) * dist**2 + label * jnp.maximum(margin - dist, 0.0) ** 2
    )


if __name__ == "__main__":
    key = jax.random.PRNGKey(0)
    ks = jax.random.split(key, 12)

    def run_case(name, x1, x2, lab, margin, **kw):
        out = contrastive_loss(x1, x2, lab, margin=margin, **kw)
        jax.block_until_ready(out)
        ref = contrastive_loss_ref(x1, x2, lab, margin=margin)
        # Tolerance also covers a worst-case single-pass-bf16 MXU path for the tiny
        # label-combine matmul; with HIGHEST precision the error is ~1e-6.
        assert jnp.allclose(out, ref, rtol=5e-3, atol=5e-3), (name, out, ref)

    # Case 1: small f32 batch, single exact tile (both hinge branches active).
    N, D = 8, 32
    x1 = 0.2 * jax.random.normal(ks[0], (N, D), dtype=jnp.float32)
    x2 = 0.2 * jax.random.normal(ks[1], (N, D), dtype=jnp.float32)
    lab = jax.random.bernoulli(ks[2], 0.5, (N,)).astype(jnp.float32)
    run_case("small_f32", x1, x2, lab, 1.0)

    # Case 2: ragged multi-tile grid (padded-row masking + label padding).
    N2, D2 = 37, 32
    y1 = jax.random.normal(ks[3], (N2, D2), dtype=jnp.float32)
    y2 = jax.random.normal(ks[4], (N2, D2), dtype=jnp.float32)
    lab2 = jax.random.bernoulli(ks[5], 0.5, (N2,)).astype(jnp.float32)
    run_case("ragged_multitile", y1, y2, lab2, 2.5, tile_rows=16)

    # Case 3: bf16 embeddings DMA'd as bf16, lane-dense D (multiple of 128).
    N3, D3 = 24, 256
    z1 = (0.05 * jax.random.normal(ks[6], (N3, D3), jnp.float32)).astype(jnp.bfloat16)
    z2 = (0.05 * jax.random.normal(ks[7], (N3, D3), jnp.float32)).astype(jnp.bfloat16)
    lab3 = jax.random.bernoulli(ks[8], 0.5, (N3,)).astype(jnp.float32)
    run_case("bf16_lane_dense", z1, z2, lab3, 1.0)

    # Case 4: auto tiling path with >=2 tiles (v7x megacore split) + ragged tail.
    N4, D4 = 384, 128
    w1 = 0.08 * jax.random.normal(ks[9], (N4, D4), dtype=jnp.float32)
    w2 = 0.08 * jax.random.normal(ks[10], (N4, D4), dtype=jnp.float32)
    lab4 = jax.random.bernoulli(ks[11], 0.5, (N4,)).astype(jnp.float32)
    run_case("auto_two_tiles", w1, w2, lab4, 1.0)

    print("KERNEL_OK")
</pallas_src>

<mosaic_0001>
module attributes {stable_mosaic.version = 11 : i64} {
  func.func @_contrastive_loss_kernel(%arg0: i32, %arg1: memref<8x32xf32, #tpu.memory_space<vmem>>, %arg2: memref<8x32xf32, #tpu.memory_space<vmem>>, %arg3: memref<1x8xf32, #tpu.memory_space<vmem>>, %arg4: memref<1x8x128xf32, #tpu.memory_space<vmem>>) attributes {dimension_semantics = [#tpu.dimension_semantics<parallel>], iteration_bounds = array<i64: 1>, scalar_prefetch = 0 : i64, scratch_operands = 0 : i64, tpu.core_type = #tpu.core_type<tc>, window_params = [{transform_indices = @transform_0, window_bounds = array<i64: 8, 32>}, {transform_indices = @transform_1, window_bounds = array<i64: 8, 32>}, {transform_indices = @transform_2, window_bounds = array<i64: 1, 8>}, {transform_indices = @transform_3, window_bounds = array<i64: 1, 8, 128>}]} {
    %c0 = arith.constant 0 : index
    %c0_0 = arith.constant 0 : index
    %0 = vector.load %arg1[%c0, %c0_0] : memref<8x32xf32, #tpu.memory_space<vmem>>, vector<8x32xf32>
    %c0_1 = arith.constant 0 : index
    %c0_2 = arith.constant 0 : index
    %1 = vector.load %arg2[%c0_1, %c0_2] : memref<8x32xf32, #tpu.memory_space<vmem>>, vector<8x32xf32>
    %2 = arith.subf %0, %1 : vector<8x32xf32>
    %cst = arith.constant 9.99999997E-7 : f32
    %3 = vector.broadcast %cst : f32 to vector<8x32xf32>
    %4 = arith.addf %2, %3 : vector<8x32xf32>
    %5 = arith.mulf %4, %4 : vector<8x32xf32>
    %cst_3 = arith.constant dense<0.000000e+00> : vector<8xf32>
    %6 = vector.multi_reduction <add>, %5, %cst_3 [1] : vector<8x32xf32> to vector<8xf32>
    %7 = vector.shape_cast %6 : vector<8xf32> to vector<8x1xf32>
    %8 = math.sqrt %7 : vector<8x1xf32>
    %cst_4 = arith.constant 1.000000e+00 : f32
    %9 = vector.broadcast %cst_4 : f32 to vector<8x1xf32>
    %10 = arith.subf %9, %8 : vector<8x1xf32>
    %cst_5 = arith.constant 0.000000e+00 : f32
    %11 = vector.broadcast %cst_5 : f32 to vector<8x1xf32>
    %12 = arith.maximumf %10, %11 : vector<8x1xf32>
    %c8_i32 = arith.constant 8 : i32
    %13 = arith.muli %arg0, %c8_i32 : i32
    %14 = tpu.iota {dimensions = array<i32: 0>} : vector<8x1xi32>
    %15 = vector.broadcast %13 : i32 to vector<8x1xi32>
    %16 = arith.addi %15, %14 : vector<8x1xi32>
    %c8_i32_6 = arith.constant 8 : i32
    %17 = vector.broadcast %c8_i32_6 : i32 to vector<8x1xi32>
    %18 = arith.cmpi slt, %16, %17 : vector<8x1xi32>
    %cst_7 = arith.constant 0.000000e+00 : f32
    %19 = vector.broadcast %cst_7 : f32 to vector<8x1xf32>
    %20 = arith.select %18, %7, %19 : vector<8x1xi1>, vector<8x1xf32>
    %21 = arith.mulf %12, %12 : vector<8x1xf32>
    %22 = arith.subf %21, %7 : vector<8x1xf32>
    %cst_8 = arith.constant 0.000000e+00 : f32
    %23 = vector.broadcast %cst_8 : f32 to vector<8x1xf32>
    %24 = arith.select %18, %22, %23 : vector<8x1xi1>, vector<8x1xf32>
    %25 = vector.shape_cast %20 : vector<8x1xf32> to vector<1x8x1xf32>
    %cst_9 = arith.constant dense<0.000000e+00> : vector<1xf32>
    %26 = vector.multi_reduction <add>, %25, %cst_9 [1, 2] : vector<1x8x1xf32> to vector<1xf32>
    %27 = vector.shape_cast %26 : vector<1xf32> to vector<1x1x1xf32>
    %28 = vector.extract %27[0, 0, 0] : f32 from vector<1x1x1xf32>
    %c0_10 = arith.constant 0 : index
    %c0_11 = arith.constant 0 : index
    %29 = vector.load %arg3[%c0_10, %c0_11] : memref<1x8xf32, #tpu.memory_space<vmem>>, vector<1x8xf32>
    %30 = vector.shape_cast %29 : vector<1x8xf32> to vector<1x8xf32>
    %31 = vector.broadcast %30 : vector<1x8xf32> to vector<8x8xf32>
    %32 = vector.shape_cast %24 : vector<8x1xf32> to vector<8x1xf32>
    %33 = vector.broadcast %32 : vector<8x1xf32> to vector<8x128xf32>
    %cst_12 = arith.constant dense<0.000000e+00> : vector<8x128xf32>
    %34 = tpu.matmul %31, %33, %cst_12 {dimension_numbers = #tpu.dot_dimension_numbers<[1], [0], [0], [1], [0, 0, 1, 1], [], []>, precision = #tpu.contract_precision<fp32>} : vector<8x8xf32>, vector<8x128xf32>, vector<8x128xf32> -> vector<8x128xf32>
    %35 = tpu.iota {dimensions = array<i32: 0>} : vector<8x128xi32>
    %36 = tpu.iota {dimensions = array<i32: 1>} : vector<8x128xi32>
    %c0_i32 = arith.constant 0 : i32
    %37 = vector.broadcast %c0_i32 : i32 to vector<8x128xi32>
    %38 = arith.cmpi eq, %35, %37 : vector<8x128xi32>
    %c0_i32_13 = arith.constant 0 : i32
    %39 = vector.broadcast %c0_i32_13 : i32 to vector<8x128xi32>
    %40 = arith.cmpi eq, %36, %39 : vector<8x128xi32>
    %41 = arith.andi %38, %40 : vector<8x128xi1>
    %42 = vector.broadcast %28 : f32 to vector<8x128xf32>
    %43 = arith.addf %42, %34 : vector<8x128xf32>
    %cst_14 = arith.constant 0.000000e+00 : f32
    %44 = vector.broadcast %cst_14 : f32 to vector<8x128xf32>
    %45 = arith.select %41, %43, %44 : vector<8x128xi1>, vector<8x128xf32>
    %c0_15 = arith.constant 0 : index
    %c0_16 = arith.constant 0 : index
    %c0_17 = arith.constant 0 : index
    %46 = vector.load %arg4[%c0_15, %c0_16, %c0_17] : memref<1x8x128xf32, #tpu.memory_space<vmem>>, vector<1x8x128xf32>
    %47 = vector.shape_cast %46 : vector<1x8x128xf32> to vector<8x128xf32>
    %48 = vector.shape_cast %45 : vector<8x128xf32> to vector<1x8x128xf32>
    tpu.vector_store %arg4[%c0_15, %c0_16, %c0_17], %48 {strides = array<i32>} : memref<1x8x128xf32, #tpu.memory_space<vmem>>, vector<1x8x128xf32>,
    return
  }
  func.func @transform_0(%arg0: i32) -> (i32, i32) {
    %c0_i32 = arith.constant 0 : i32
    %c0_i32_0 = arith.constant 0 : i32
    return %arg0, %c0_i32 : i32, i32
  }
  func.func @transform_1(%arg0: i32) -> (i32, i32) {
    %c0_i32 = arith.constant 0 : i32
    %c0_i32_0 = arith.constant 0 : i32
    return %arg0, %c0_i32 : i32, i32
  }
  func.func @transform_2(%arg0: i32) -> (i32, i32) {
    %c0_i32 = arith.constant 0 : i32
    %c0_i32_0 = arith.constant 0 : i32
    return %arg0, %c0_i32 : i32, i32
  }
  func.func @transform_3(%arg0: i32) -> (i32, i32, i32) {
    %c0_i32 = arith.constant 0 : i32
    %c0_i32_0 = arith.constant 0 : i32
    %c0_i32_1 = arith.constant 0 : i32
    return %arg0, %c0_i32, %c0_i32_0 : i32, i32, i32
  }
}

</mosaic_0001>

<bundles_post_ra>
// kernel: tpu_custom_call.1
= control target key start
LH: loop header
LB: loop body
LE: loop exit
PB: predicated region body
PF: predicated region fallthrough
CT: control target
= control target key end

     0   :  { %8 = vsyncpa [#allocation3], 0  ;;  %s719_s0 = inlined_call_operand.hbm [shape: f32[8,32], index: 0, kind: input, shape index: {}]   ;;  %s720_s1 = inlined_call_operand.hbm [shape: f32[8,32], index: 1, kind: input, shape index: {}]   ;;  %s721_s2 = inlined_call_operand.vmem [shape: f32[1,8], index: 2, kind: input, shape index: {}]   ;;  %s722_s3 = inlined_call_operand.hbm [shape: f32[1,8,128], index: 3, kind: output, shape index: {}]  }
   0x1   :  { %9 = vsyncpa [#allocation6], 0 }
   0x2   :  { %10 = vsyncpa [#allocation4], 0  ;;  %s676_s12 = smov [#allocation2]   ;;  %s677_s14 = smov [#allocation5]  }
   0x3   :  { %s17_s13 = sshll.u32 %s676_s12, 4  ;;  %s27_s15 = sshll.u32 %s677_s14, 4  ;;  %s18_s13 = int_to_ptr.vmem [resolvable:$true] %s17_s13  ;;  %s28_s15 = int_to_ptr.vmem [resolvable:$true] %s27_s15 }
   0x4   :  { %s618_s16 = scalar_lea.vmem %s18_s13, 128  ;;  %p623_p1 = scmp.lt.s32.totalorder %s18_s13, %s18_s13 }
   0x5   :  { %p619_p0 = scmp.ne.s32.totalorder %s18_s13, %s618_s16  ;;  %p624_p2 = scmp.lt.s32.totalorder %s618_s16, %s618_s16 }
   0x7   :  { %p625_p3 = por %p624_p2, %p623_p1 }
   0x9   :  { %p626_p4 = pnand %p625_p3, %p619_p0 }
   0xb   :  { %629 = shalt.err (!%p626_p4)
}
   0xc   :  { %20 = dma.hbm_to_vmem [thread:$0]  %s719_s0, 128, %s18_s13, [#allocation3]  }
   0xd   :  { %s638_s19 = scalar_lea.vmem %s28_s15, 128  ;;  %p643_p6 = scmp.lt.s32.totalorder %s28_s15, %s28_s15 }
   0xe   :  { %p639_p5 = scmp.ne.s32.totalorder %s28_s15, %s638_s19  ;;  %p644_p7 = scmp.lt.s32.totalorder %s638_s19, %s638_s19 }
  0x10   :  { %p645_p8 = por %p644_p7, %p643_p6 }
  0x12   :  { %p646_p9 = pnand %p645_p8, %p639_p5 }
  0x14   :  { %649 = shalt.err (!%p646_p9)
}
  0x15   :  { %30 = dma.hbm_to_vmem [thread:$0]  %s720_s1, 128, %s28_s15, [#allocation6]  }
  0x16   :  { %670 = dma.done.wait [#allocation3], 128  }
  0x17   :  { %671 = vsyncadd [#allocation3], 4294967168 }
  0x18   :  { %672 = dma.done.wait [#allocation6], 128  }
  0x19   :  { %673 = vsyncadd [#allocation6], 4294967168  ;;  %v39_v0 = vld [vmem:[#allocation2] sm:$0xff]  ;;  %v40_v1 = vld [vmem:[#allocation5] sm:$0xff]  ;;  %vm44_vm0 = vcmask 261120   ;;  %v678_v6 = vmov 0.0   ;;  %v58_v41 = vlaneseq }
  0x1a   :  { %v41_v2 = vsub.f32 %v39_v0, %v40_v1  ;;  %571 = vmatprep.subr.mxu0 %v678_v6  ;;  %576 = vmatprep.subr.mxu1 %v678_v6  ;;  %vm679_vm1 = vmmov 0   ;;  %vm67_vm2 = vcmask 7168   ;;  %v558_v9 = vld [vmem:[%s721_s2] ss:$0 sm:$0xff]  ;;  %vm84_vm3 = vcmask 64512   ;;  %s680_s22 = smov [#allocation7]  }
  0x1b   :  { %573 = vmatprep.mubr.msk.f32.mxu0 %vm679_vm1, %v678_v6  ;;  %578 = vmatprep.mubr.msk.f32.mxu1 %vm679_vm1, %v678_v6  ;;  %v85_v10 = vsel %vm84_vm3, %v558_v9, 0  ;;  %v59_v47 = vshrl.u32 %v58_v41, 7  ;;  %v534_v48 = vand.u32 127, %v58_v41  ;;  %s548_s23 = sshll.u32 %s680_s22, 4  ;;  %s549_s23 = int_to_ptr.vmem [resolvable:$true] %s548_s23 }
  0x1c   :  { %v42_v3 = vadd.f32 1e-06, %v41_v2  ;;  %v153_v11 = vand.u32 4294901760, %v85_v10  ;;  %s650_s24 = scalar_lea.vmem %s549_s23, 128  ;;  %p655_p11 = scmp.lt.s32.totalorder %s549_s23, %s549_s23 }
  0x1d   :  { %vm535_vm6 = vcmp.eq.s32.totalorder %v59_v47, 0  ;;  %vm536_vm7 = vcmp.eq.s32.totalorder %v534_v48, 0  ;;  %p651_p10 = scmp.ne.s32.totalorder %s549_s23, %s650_s24  ;;  %p656_p12 = scmp.lt.s32.totalorder %s650_s24, %s650_s24 }
  0x1e   :  { %v43_v4 = vmul.f32 %v42_v3, %v42_v3  ;;  %v154_v13 = vsub.f32 %v85_v10, %v153_v11  ;;  %vm537_vm8 = vmand %vm535_vm6, %vm536_vm7 }
  0x1f   :  { %p657_p13 = por %p656_p12, %p655_p11 }
  0x20   :  { %v45_v5 = vsel %vm44_vm0, %v43_v4, 0.0  ;;  %v155_v18 = vand.u32 4294901760, %v154_v13 }
  0x21   :  { %46 = vadd.xlane.f32.xlu0 %v45_v5  ;;  %p658_p0 = pnand %p657_p13, %p651_p10 }
  0x22   :  { %v156_v21 = vsub.f32 %v154_v13, %v155_v18 }
  0x24   :  { %v157_v24 = vand.u32 4294901760, %v156_v21 }
  0xaa   :  { %v47_v7 = vpop.xlane.xlu0 %46 }
  0xab   :  { %608 = vrsqrt.f32 %v47_v7  ;;  %v68_v8 = vsel %vm67_vm2, %v47_v7, 0.0  ;;  %vm50_vm4 = vcmp.eq.f32.partialorder %v47_v7, inf  ;;  %v53_v15 = vand.u32 2147483648, %v47_v7 }
  0xac   :  { %69 = vadd.xlane.f32.xlu0 %v68_v8  ;;  %vm52_vm5 = vcmp.eq.f32.partialorder %v47_v7, 0.0 }
  0xb8   :  { %v609_v12 = vpop.eup %608 }
  0xb9   :  { %v49_v14 = vmul.f32 %v609_v12, %v47_v7 }
  0xbb   :  { %v51_v16 = vsel %vm50_vm4, %v47_v7, %v49_v14 }
  0xbc   :  { %v54_v17 = vsel %vm52_vm5, %v53_v15, %v51_v16 }
  0xbd   :  { %v55_v19 = vsub.f32 1.0, %v54_v17 }
  0xbf   :  { %v56_v20 = vmax.f32 %v55_v19, 0.0 }
  0xc1   :  { %v64_v22 = vmul.f32 %v56_v20, %v56_v20 }
  0xc3   :  { %v65_v23 = vsub.f32 %v64_v22, %v47_v7 }
  0xc5   :  { %v118_v25 = vand.u32 4294901760, %v65_v23 }
  0xc7   :  { %572 = vmatpush3.msra.mxu0 %v118_v25  ;;  %v195_v26 = vsub.f32 %v65_v23, %v118_v25 }
  0xc8   :  { %574 = vmatmul.mubr.f32.vlgmr.msra.gmra.mxu0 %v157_v24  ;;  %581 = vmatprep.subr.mxu0 %v678_v6 }
  0xc9   :  { %582 = vmatpush3.msra.mxu0 %v195_v26  ;;  %583 = vmatprep.mubr.msk.f32.mxu0 %vm679_vm1, %v678_v6  ;;  %v196_v27 = vand.u32 4294901760, %v195_v26 }
  0xca   :  { %591 = vmatprep.subr.mxu0 %v678_v6 }
  0xcb   :  { %v197_v28 = vsub.f32 %v195_v26, %v196_v27 }
  0xcc   :  { %584 = vmatmul.mubr.f32.vlgmr.msra.gmra.mxu0 %v154_v13 }
  0xcd   :  { %592 = vmatpush3.msra.mxu0 %v196_v27  ;;  %v198_v29 = vand.u32 4294901760, %v197_v28  ;;  %593 = vmatprep.mubr.msk.f32.mxu0 %vm679_vm1, %v678_v6 }
  0xcf   :  { %577 = vmatpush3.msra.mxu1 %v198_v29 }
  0xd0   :  { %579 = vmatmul.mubr.f32.vlgmr.msra.gmra.mxu1 %v153_v11  ;;  %586 = vmatprep.subr.mxu1 %v678_v6 }
  0xd1   :  { %587 = vmatpush3.msra.mxu1 %v118_v25  ;;  %588 = vmatprep.mubr.msk.f32.mxu1 %vm679_vm1, %v678_v6 }
  0xd2   :  { %596 = vmatprep.subr.mxu1 %v678_v6  ;;  %594 = vmatmul.mubr.f32.vlgmr.msra.gmra.mxu0 %v153_v11 }
  0xd4   :  { %589 = vmatmul.mubr.f32.vlgmr.msra.gmra.mxu1 %v155_v18 }
  0xd5   :  { %597 = vmatpush3.msra.mxu1 %v118_v25  ;;  %598 = vmatprep.mubr.msk.f32.mxu1 %vm679_vm1, %v678_v6 }
  0xd8   :  { %599 = vmatmul.mubr.f32.vlgmr.msra.gmra.mxu1 %v153_v11 }
 0x135   :  { %v70_v30 = vpop.xlane.xlu0 %69 }
 0x136   :  { %v71_v31 = vrot.slane %v70_v30, 4 }
 0x138   :  { %v72_v32 = vadd.f32 %v71_v31, %v70_v30 }
 0x13a   :  { %v73_v33 = vrot.slane %v72_v32, 2 }
 0x13c   :  { %v74_v34 = vadd.f32 %v73_v33, %v72_v32 }
 0x13e   :  { %v75_v35 = vrot.slane %v74_v34, 1 }
 0x140   :  { %v76_v36 = vadd.f32 %v75_v35, %v74_v34 }
 0x142   :  { %601 = vpush %v76_v36 }
 0x173   :  { %s602_s2 = spop %601 }
 0x174   :  { %v538_v56 = vstv %s602_s2 }
 0x188   :  { %v159_v37 = vpop.f32.mrf.mxu0 }
 0x18a   :  { %v575_v38 = vpop.f32.mrf.mxu0 }
 0x18c   :  { %v309_v39 = vpop.f32.mrf.mxu0 }
 0x18e   :  { %v585_v40 = vpop.f32.mrf.mxu0 }
 0x190   :  { %v235_v42 = vpop.f32.mrf.mxu1 }
 0x191   :  { %v236_v43 = vadd.f32 %v235_v42, %v159_v37 }
 0x192   :  { %v580_v44 = vpop.f32.mrf.mxu1  ;;  %v457_v45 = vpop.f32.mrf.mxu0 }
 0x193   :  { %v310_v46 = vadd.f32 %v309_v39, %v236_v43 }
 0x194   :  { %v383_v49 = vpop.f32.mrf.mxu1  ;;  %v595_v50 = vpop.f32.mrf.mxu0 }
 0x195   :  { %v384_v51 = vadd.f32 %v383_v49, %v310_v46 }
 0x196   :  { %v590_v52 = vpop.f32.mrf.mxu1 }
 0x197   :  { %v458_v53 = vadd.f32 %v457_v45, %v384_v51 }
 0x198   :  { %v529_v54 = vpop.f32.mrf.mxu1 }
 0x199   :  { %v530_v55 = vadd.f32 %v529_v54, %v458_v53 }
 0x19a   :  { %v600_v57 = vpop.f32.mrf.mxu1 }
 0x19b   :  { %v539_v58 = vadd.f32 %v538_v56, %v530_v55 }
 0x19d   :  { %v540_v59 = vsel %vm537_vm8, %v539_v58, 0.0 }
 0x19e   :  { %541 = vst [vmem:[#allocation7] sm:$0xff] %v540_v59 }
 0x19f   :  { %661 = shalt.err (!%p658_p0)
}
 0x1a0   :  { %551 = dma.vmem_to_hbm [thread:$0]  %s549_s23, 128, %s722_s3, [#allocation4]  }
 0x1a1   :  { %674 = dma.done.wait [#allocation4], 128  }
 0x1a2   :  { %675 = vsyncadd [#allocation4], 4294967168 }
 0x1a3   :  { %555 = vsyncpa [#allocation3], 1 }
 0x1a4   :  { %556 = vsyncpa [#allocation6], 1 }
 0x1a5   :  { %557 = vsyncpa [#allocation4], 1 }

</bundles_post_ra>
